<compile_context>
chip_gen: v7x
topology: tpu7x:2x2x1
jax: 0.10.0
libtpu: 0.0.40
codegen_flags: <defaults>
</compile_context>

<pallas_src>
import functools

import jax
import jax.numpy as jnp
from jax.experimental import pallas as pl
from jax.experimental.pallas import tpu as pltpu


def _atom_reactivity_kernel(x_ref, w1_ref, b_ref, w2_ref, w3_ref, o_ref, *,
                            matmul_dtype, act_dtype):
    """fc1 -> SiLU -> fc2 -> SiLU -> fc3 for one (tm, d_in) row tile."""
    x = x_ref[...]
    b = b_ref[...]                       # (3, H) f32, VMEM-resident: [b1; b2; b3]

    # fc1 on the MXU (f32 accumulation), bias add in f32, SiLU in act_dtype.
    h = jnp.dot(x.astype(matmul_dtype), w1_ref[...],
                preferred_element_type=jnp.float32) + b[0:1, :]
    h = h.astype(act_dtype)
    h = h * jax.nn.sigmoid(h)            # SiLU (sigmoid -> EUP)

    # fc2 + SiLU.  When act_dtype == matmul_dtype the astype is a no-op.
    h = jnp.dot(h.astype(matmul_dtype), w2_ref[...],
                preferred_element_type=jnp.float32) + b[1:2, :]
    h = h.astype(act_dtype)
    h = h * jax.nn.sigmoid(h)

    # fc3 (hidden -> 1): multiply by the f32 row weight (promotes to f32) and
    # lane-reduce on the XLU; bias is row 2 of the stacked bias block.
    logits = jnp.sum(h * w3_ref[...], axis=-1, keepdims=True) + b[2:3, 0:1]

    o_ref[...] = logits.astype(o_ref.dtype)


def atom_reactivity_logits(node_embedding, params, *, tm=1024, min_steps=2,
                           matmul_dtype=jnp.bfloat16, act_dtype=None,
                           out_dtype=jnp.float32, vmem_limit_bytes=None):
    """node_embedding: [..., node_emb_dim]; returns logits of shape [...].

    Sweep tm over {1024, 2048, 4096} on real workloads (subject to >= min_steps
    grid steps on v7x and the VMEM budget -- raise vmem_limit_bytes on v5e for
    large tm, shrink tm / keep bf16 intermediates on v7x's 64 MiB VMEM).
    """
    *lead, d_in = node_embedding.shape
    x2d = node_embedding.reshape(-1, d_in)
    n = x2d.shape[0]
    h_dim = params["w1"].shape[1]

    if act_dtype is None:
        act_dtype = matmul_dtype

    # Cast MXU operands once here (not per grid step inside the kernel).
    # Biases and w3 stay f32: bias-add and the final reduce are done in f32.
    w1 = params["w1"].astype(matmul_dtype)
    w2 = params["w2"].astype(matmul_dtype)
    w3 = params["w3"].astype(jnp.float32)
    b123 = params["b123"].astype(jnp.float32)

    # Row tile: as large as possible (amortize ~0.35us/step), multiple of 8
    # sublanes, capped so the grid has >= min_steps steps (v7x has 2 TCs).
    def _round8(v):
        return max(8, ((int(v) + 7) // 8) * 8)

    tm = _round8(min(int(tm), _round8(pl.cdiv(n, min_steps)), _round8(n)))
    n_blocks = pl.cdiv(n, tm)  # ragged last block handled by Pallas (masked writeback)

    kernel = functools.partial(_atom_reactivity_kernel,
                               matmul_dtype=matmul_dtype, act_dtype=act_dtype)

    def row_spec(cols):
        return pl.BlockSpec((tm, cols), lambda i: (i, 0))

    def const_spec(r, c):
        # Constant index_map: block never changes across the grid, so the
        # pipeline keeps it resident and does not re-DMA it per step.
        return pl.BlockSpec((r, c), lambda i: (0, 0))

    out = pl.pallas_call(
        kernel,
        out_shape=jax.ShapeDtypeStruct((n, 1), out_dtype),
        grid_spec=pltpu.PrefetchScalarGridSpec(
            num_scalar_prefetch=0,
            grid=(n_blocks,),
            in_specs=[
                row_spec(d_in),            # x tile (cast in-kernel only if needed)
                const_spec(d_in, h_dim),   # w1 (resident, matmul_dtype)
                const_spec(3, h_dim),      # [b1; b2; b3] stacked (resident, f32)
                const_spec(h_dim, h_dim),  # w2 (resident, matmul_dtype)
                const_spec(1, h_dim),      # w3 row vector (resident, f32)
            ],
            out_specs=row_spec(1),
        ),
        compiler_params=pltpu.CompilerParams(
            dimension_semantics=("parallel",),
            vmem_limit_bytes=vmem_limit_bytes),
    )(x2d, w1, b123, w2, w3)

    return out.reshape(tuple(lead))        # squeeze(-1)


def init_params(key, node_emb_dim, hidden_dim):
    """Synthetic init matching nn.Linear defaults.

    Linear weights stored as [in, out] (transpose of PyTorch's [out, in]),
    except fc3 which is kept as its natural [1, hidden] row vector.  Biases
    are stacked into a single (3, hidden) f32 block: rows = b1, b2, b3."""
    ks = jax.random.split(key, 6)

    def lin(kw, kb, fan_in, shape_w, shape_b):
        bound = 1.0 / jnp.sqrt(jnp.float32(fan_in))
        w = jax.random.uniform(kw, shape_w, jnp.float32, -bound, bound)
        b = jax.random.uniform(kb, shape_b, jnp.float32, -bound, bound)
        return w, b

    w1, b1 = lin(ks[0], ks[1], node_emb_dim, (node_emb_dim, hidden_dim), (1, hidden_dim))
    w2, b2 = lin(ks[2], ks[3], hidden_dim, (hidden_dim, hidden_dim), (1, hidden_dim))
    w3, b3 = lin(ks[4], ks[5], hidden_dim, (1, hidden_dim), (1, 1))
    b3_row = jnp.broadcast_to(b3, (1, hidden_dim))
    return {
        "w1": w1, "w2": w2, "w3": w3,
        "b123": jnp.concatenate([b1, b2, b3_row], axis=0),   # (3, hidden)
    }


def atom_reactivity_ref(x, p):
    h = x @ p["w1"] + p["b123"][0:1, :]
    h = h * jax.nn.sigmoid(h)
    h = h @ p["w2"] + p["b123"][1:2, :]
    h = h * jax.nn.sigmoid(h)
    return (h * p["w3"]).sum(-1) + p["b123"][2, 0]


if __name__ == "__main__":
    key = jax.random.PRNGKey(0)
    k_x, k_p = jax.random.split(key)

    node_emb_dim, hidden_dim = 64, 128
    params = init_params(k_p, node_emb_dim, hidden_dim)

    # 1) f32 MXU path, even N -> 2 full grid steps, tight tolerance.
    x_a = jax.random.normal(k_x, (256, node_emb_dim), jnp.float32)
    out_a = jax.block_until_ready(
        atom_reactivity_logits(x_a, params, matmul_dtype=jnp.float32))
    ref_a = atom_reactivity_ref(x_a, params)
    assert out_a.shape == (256,)
    assert jnp.allclose(out_a, ref_a, atol=1e-4, rtol=1e-4), "f32 path mismatch"

    # 2) Default bf16 path, ragged N (exercises the partial last block / masked
    #    output writeback).  Looser tolerance: bf16 operands, f32 accumulation.
    x_b = x_a[:250]
    out_b = jax.block_until_ready(atom_reactivity_logits(x_b, params))
    ref_b = atom_reactivity_ref(x_b, params)
    assert out_b.shape == (250,)
    assert jnp.allclose(out_b, ref_b, atol=5e-2, rtol=5e-2), "bf16 path mismatch"

    print("KERNEL_OK")
</pallas_src>

<mosaic_0001>
module attributes {stable_mosaic.version = 11 : i64} {
  func.func @_atom_reactivity_kernel(%arg0: i32, %arg1: memref<128x64xf32, #tpu.memory_space<vmem>>, %arg2: memref<64x128xf32, #tpu.memory_space<vmem>>, %arg3: memref<3x128xf32, #tpu.memory_space<vmem>>, %arg4: memref<128x128xf32, #tpu.memory_space<vmem>>, %arg5: memref<1x128xf32, #tpu.memory_space<vmem>>, %arg6: memref<128x1xf32, #tpu.memory_space<vmem>>) attributes {dimension_semantics = [#tpu.dimension_semantics<parallel>], iteration_bounds = array<i64: 2>, scalar_prefetch = 0 : i64, scratch_operands = 0 : i64, tpu.core_type = #tpu.core_type<tc>, window_params = [{transform_indices = @transform_0, window_bounds = array<i64: 128, 64>}, {pipeline_mode = #tpu.pipeline_mode<synchronous>, transform_indices = @transform_1, window_bounds = array<i64: 64, 128>}, {pipeline_mode = #tpu.pipeline_mode<synchronous>, transform_indices = @transform_2, window_bounds = array<i64: 3, 128>}, {pipeline_mode = #tpu.pipeline_mode<synchronous>, transform_indices = @transform_3, window_bounds = array<i64: 128, 128>}, {pipeline_mode = #tpu.pipeline_mode<synchronous>, transform_indices = @transform_4, window_bounds = array<i64: 1, 128>}, {transform_indices = @transform_5, window_bounds = array<i64: 128, 1>}]} {
    %c0 = arith.constant 0 : index
    %c0_0 = arith.constant 0 : index
    %0 = vector.load %arg1[%c0, %c0_0] : memref<128x64xf32, #tpu.memory_space<vmem>>, vector<128x64xf32>
    %c0_1 = arith.constant 0 : index
    %c0_2 = arith.constant 0 : index
    %1 = vector.load %arg3[%c0_1, %c0_2] : memref<3x128xf32, #tpu.memory_space<vmem>>, vector<3x128xf32>
    %c0_3 = arith.constant 0 : index
    %c0_4 = arith.constant 0 : index
    %2 = vector.load %arg2[%c0_3, %c0_4] : memref<64x128xf32, #tpu.memory_space<vmem>>, vector<64x128xf32>
    %cst = arith.constant dense<0.000000e+00> : vector<128x128xf32>
    %3 = tpu.matmul %0, %2, %cst {dimension_numbers = #tpu.dot_dimension_numbers<[1], [0], [0], [1], [0, 0, 1, 1], [], []>} : vector<128x64xf32>, vector<64x128xf32>, vector<128x128xf32> -> vector<128x128xf32>
    %4 = vector.extract_strided_slice %1 {offsets = [0, 0], sizes = [1, 128], strides = [1, 1]} : vector<3x128xf32> to vector<1x128xf32>
    %5 = vector.broadcast %4 : vector<1x128xf32> to vector<128x128xf32>
    %6 = arith.addf %3, %5 : vector<128x128xf32>
    %7 = arith.negf %6 : vector<128x128xf32>
    %8 = math.exp %7 : vector<128x128xf32>
    %cst_5 = arith.constant 1.000000e+00 : f32
    %9 = vector.broadcast %cst_5 : f32 to vector<128x128xf32>
    %10 = arith.addf %9, %8 : vector<128x128xf32>
    %11 = arith.divf %9, %10 : vector<128x128xf32>
    %12 = arith.mulf %6, %11 : vector<128x128xf32>
    %c0_6 = arith.constant 0 : index
    %c0_7 = arith.constant 0 : index
    %13 = vector.load %arg4[%c0_6, %c0_7] : memref<128x128xf32, #tpu.memory_space<vmem>>, vector<128x128xf32>
    %cst_8 = arith.constant dense<0.000000e+00> : vector<128x128xf32>
    %14 = tpu.matmul %12, %13, %cst_8 {dimension_numbers = #tpu.dot_dimension_numbers<[1], [0], [0], [1], [0, 0, 1, 1], [], []>} : vector<128x128xf32>, vector<128x128xf32>, vector<128x128xf32> -> vector<128x128xf32>
    %15 = vector.extract_strided_slice %1 {offsets = [1, 0], sizes = [1, 128], strides = [1, 1]} : vector<3x128xf32> to vector<1x128xf32>
    %16 = vector.broadcast %15 : vector<1x128xf32> to vector<128x128xf32>
    %17 = arith.addf %14, %16 : vector<128x128xf32>
    %18 = arith.negf %17 : vector<128x128xf32>
    %19 = math.exp %18 : vector<128x128xf32>
    %cst_9 = arith.constant 1.000000e+00 : f32
    %20 = vector.broadcast %cst_9 : f32 to vector<128x128xf32>
    %21 = arith.addf %20, %19 : vector<128x128xf32>
    %22 = arith.divf %20, %21 : vector<128x128xf32>
    %23 = arith.mulf %17, %22 : vector<128x128xf32>
    %c0_10 = arith.constant 0 : index
    %c0_11 = arith.constant 0 : index
    %24 = vector.load %arg5[%c0_10, %c0_11] : memref<1x128xf32, #tpu.memory_space<vmem>>, vector<1x128xf32>
    %25 = vector.broadcast %24 : vector<1x128xf32> to vector<128x128xf32>
    %26 = arith.mulf %23, %25 : vector<128x128xf32>
    %cst_12 = arith.constant dense<0.000000e+00> : vector<128xf32>
    %27 = vector.multi_reduction <add>, %26, %cst_12 [1] : vector<128x128xf32> to vector<128xf32>
    %28 = vector.shape_cast %27 : vector<128xf32> to vector<128x1xf32>
    %29 = vector.extract_strided_slice %1 {offsets = [2, 0], sizes = [1, 1], strides = [1, 1]} : vector<3x128xf32> to vector<1x1xf32>
    %30 = vector.broadcast %29 : vector<1x1xf32> to vector<128x1xf32>
    %31 = arith.addf %28, %30 : vector<128x1xf32>
    %c0_13 = arith.constant 0 : index
    %c0_14 = arith.constant 0 : index
    %32 = vector.load %arg6[%c0_13, %c0_14] : memref<128x1xf32, #tpu.memory_space<vmem>>, vector<128x1xf32>
    tpu.vector_store %arg6[%c0_13, %c0_14], %31 {strides = array<i32>} : memref<128x1xf32, #tpu.memory_space<vmem>>, vector<128x1xf32>,
    return
  }
  func.func @transform_0(%arg0: i32) -> (i32, i32) {
    %c0_i32 = arith.constant 0 : i32
    %c0_i32_0 = arith.constant 0 : i32
    return %arg0, %c0_i32 : i32, i32
  }
  func.func @transform_1(%arg0: i32) -> (i32, i32) {
    %c0_i32 = arith.constant 0 : i32
    %c0_i32_0 = arith.constant 0 : i32
    %c0_i32_1 = arith.constant 0 : i32
    return %c0_i32, %c0_i32_0 : i32, i32
  }
  func.func @transform_2(%arg0: i32) -> (i32, i32) {
    %c0_i32 = arith.constant 0 : i32
    %c0_i32_0 = arith.constant 0 : i32
    %c0_i32_1 = arith.constant 0 : i32
    return %c0_i32, %c0_i32_0 : i32, i32
  }
  func.func @transform_3(%arg0: i32) -> (i32, i32) {
    %c0_i32 = arith.constant 0 : i32
    %c0_i32_0 = arith.constant 0 : i32
    %c0_i32_1 = arith.constant 0 : i32
    return %c0_i32, %c0_i32_0 : i32, i32
  }
  func.func @transform_4(%arg0: i32) -> (i32, i32) {
    %c0_i32 = arith.constant 0 : i32
    %c0_i32_0 = arith.constant 0 : i32
    %c0_i32_1 = arith.constant 0 : i32
    return %c0_i32, %c0_i32_0 : i32, i32
  }
  func.func @transform_5(%arg0: i32) -> (i32, i32) {
    %c0_i32 = arith.constant 0 : i32
    %c0_i32_0 = arith.constant 0 : i32
    return %arg0, %c0_i32 : i32, i32
  }
}

</mosaic_0001>

<bundles_post_ra>
// kernel: tpu_custom_call.1
= control target key start
LH: loop header
LB: loop body
LE: loop exit
PB: predicated region body
PF: predicated region fallthrough
CT: control target
= control target key end

     0   :  { %s1438_s18 = smov 0   ;;  %s1800_s0 = inlined_call_operand.vmem [shape: f32[256,64], index: 0, kind: input, shape index: {}]   ;;  %s1801_s1 = inlined_call_operand.vmem [shape: f32[64,128], index: 1, kind: input, shape index: {}]   ;;  %s1802_s2 = inlined_call_operand.vmem [shape: f32[3,128], index: 2, kind: input, shape index: {}]   ;;  %s1803_s3 = inlined_call_operand.vmem [shape: f32[128,128], index: 3, kind: input, shape index: {}]   ;;  %s1804_s4 = inlined_call_operand.vmem [shape: f32[1,128], index: 4, kind: input, shape index: {}]   ;;  %s1805_s5 = inlined_call_operand.vmem [shape: f32[256,1], index: 5, kind: output, shape index: {}]  }
   0x1 LB: > { %s988_s19 = sadd.s32 4294967295, %s1406_s18   ;;  %p992_p0 = scmp.ge.s32.totalorder %s1406_s18, 1  ;;  %s1406_s18 = sphi %s1438_s18, %s15_s18  }
   0x2   : > { %p188_p1 = scmp.lt.s32.totalorder %s1406_s18, 3 }
   0x4   : > { %p189_p2 = pnand %p992_p0, %p188_p1 }
   0x5   : > { %v245_v0 = vld [vmem:[%s1801_s1] sm:$0xff] (!%p189_p2)  ;;  %v246_v1 = vld [vmem:[%s1801_s1 + $0x8] sm:$0xff] (!%p189_p2)  ;;  %v247_v2 = vld [vmem:[%s1801_s1 + $0x10] sm:$0xff] (!%p189_p2)  ;;  %s993_s26 = sshll.u32 (!%p189_p2), %s988_s19, 4  ;;  %vm257_vm0 = vcmask (!%p189_p2), 523264   ;;  %v253_v52 = vlaneseq (!%p189_p2)  ;;  %vm915_vm1 = vcmask (!%p189_p2), 7168  }
   0x6   : > { %192 = sbr.rel (%p189_p2) target bundleno = 689 (0x2b1), region = 40  ;;  %v1200_v3 = vpack.c.bf16 (!%p189_p2), %v246_v1, %v245_v0  ;;  %v248_v4 = vld [vmem:[%s1801_s1 + $0x18] sm:$0xff] (!%p189_p2)  ;;  %p217_p3 = scmp.lt.s32.totalorder (!%p189_p2), %s993_s26, 31  ;;  %v249_v6 = vld [vmem:[%s1801_s1 + $0x20] sm:$0xff] (!%p189_p2)  ;;  %v250_v7 = vld [vmem:[%s1801_s1 + $0x28] sm:$0xff] (!%p189_p2) }
   0x7   : > { %v1204_v5 = vpack.c.bf16 (!%p189_p2), %v248_v4, %v247_v2  ;;  %v1208_v8 = vpack.c.bf16 (!%p189_p2), %v250_v7, %v249_v6  ;;  %v251_v9 = vld [vmem:[%s1801_s1 + $0x30] sm:$0xff] (!%p189_p2)  ;;  %v252_v10 = vld [vmem:[%s1801_s1 + $0x38] sm:$0xff] (!%p189_p2)  ;;  %v563_v28 = vld [vmem:[%s1803_s3] sm:$0xff] (!%p189_p2)  ;;  %v1560_v53 = vshrl.u32 (!%p189_p2), %v253_v52, 7 }
   0x8   : > { %1201 = vmatprep.subr.bf16.mxu0 (!%p189_p2), %v1200_v3  ;;  %v1212_v12 = vpack.c.bf16 (!%p189_p2), %v252_v10, %v251_v9  ;;  %v564_v29 = vld [vmem:[%s1803_s3 + $0x8] sm:$0xff] (!%p189_p2)  ;;  %v565_v31 = vld [vmem:[%s1803_s3 + $0x10] sm:$0xff] (!%p189_p2)  ;;  %v566_v32 = vld [vmem:[%s1803_s3 + $0x18] sm:$0xff] (!%p189_p2) }
   0x9   : > { %1203 = vmatpush3.bf16.msra.mxu0 (!%p189_p2), %v1200_v3  ;;  %v1216_v30 = vpack.c.bf16 (!%p189_p2), %v564_v29, %v563_v28  ;;  %v1220_v33 = vpack.c.bf16 (!%p189_p2), %v566_v32, %v565_v31  ;;  %v567_v34 = vld [vmem:[%s1803_s3 + $0x20] sm:$0xff] (!%p189_p2)  ;;  %v568_v35 = vld [vmem:[%s1803_s3 + $0x28] sm:$0xff] (!%p189_p2)  ;;  %v569_v37 = vld [vmem:[%s1803_s3 + $0x30] sm:$0xff] (!%p189_p2)  ;;  %v255_v54 = vsub.s32 (!%p189_p2), 0, %v1560_v53 }
   0xa   : > { %1205 = vmatprep.subr.bf16.mxu0 (!%p189_p2), %v1204_v5  ;;  %v1224_v36 = vpack.c.bf16 (!%p189_p2), %v568_v35, %v567_v34  ;;  %v570_v38 = vld [vmem:[%s1803_s3 + $0x38] sm:$0xff] (!%p189_p2)  ;;  %v571_v40 = vld [vmem:[%s1803_s3 + $0x40] sm:$0xff] (!%p189_p2)  ;;  %v572_v41 = vld [vmem:[%s1803_s3 + $0x48] sm:$0xff] (!%p189_p2) }
   0xb   : > { %1248 = vmatprep.subr.bf16.mxu1 (!%p189_p2), %v1216_v30  ;;  %v1228_v39 = vpack.c.bf16 (!%p189_p2), %v570_v38, %v569_v37  ;;  %v1232_v42 = vpack.c.bf16 (!%p189_p2), %v572_v41, %v571_v40  ;;  %v573_v43 = vld [vmem:[%s1803_s3 + $0x50] sm:$0xff] (!%p189_p2)  ;;  %v574_v44 = vld [vmem:[%s1803_s3 + $0x58] sm:$0xff] (!%p189_p2)  ;;  %v575_v46 = vld [vmem:[%s1803_s3 + $0x60] sm:$0xff] (!%p189_p2) }
   0xc   : > { %1256 = vmatpush3.bf16.msra.mxu1 (!%p189_p2), %v1216_v30  ;;  %v1236_v45 = vpack.c.bf16 (!%p189_p2), %v574_v44, %v573_v43  ;;  %v576_v47 = vld [vmem:[%s1803_s3 + $0x68] sm:$0xff] (!%p189_p2)  ;;  %v577_v49 = vld [vmem:[%s1803_s3 + $0x70] sm:$0xff] (!%p189_p2)  ;;  %v578_v50 = vld [vmem:[%s1803_s3 + $0x78] sm:$0xff] (!%p189_p2) }
   0xd   : > { %s1807_s26 = smov (!%p217_p3, %s993_s26), 31  ;;  %1207 = vmatpush3.bf16.msra.mxu0 %v1204_v5  ;;  %1249 = vmatprep.subr.bf16.mxu1 %v1220_v33  ;;  %v1240_v48 = vpack.c.bf16 %v576_v47, %v575_v46  ;;  %v1244_v51 = vpack.c.bf16 %v578_v50, %v577_v49  ;;  %v1566_v55 = vld [vmem:[%s1802_s2] sm:$0x7] }
   0xe   : > { %s994_s8 = sshll.u32 %s1807_s26, 3  ;;  %1209 = vmatprep.subr.bf16.mxu0 %v1208_v8  ;;  %v1569_v56 = vrot.slane %v1566_v55, %v255_v54 }
   0xf   : > { %s1478_s15 = scalar_lea.vmem %s1800_s0, %s994_s8  ;;  %s1763_s10 = scalar_lea.vmem %s1805_s5, %s994_s8 }
  0x10   : > { %v228_v11 = vld [vmem:[%s1478_s15] sm:$0xff]  ;;  %v229_v13 = vld [vmem:[%s1478_s15 + $0x8] sm:$0xff]  ;;  %v230_v14 = vld [vmem:[%s1478_s15 + $0x10] sm:$0xff]  ;;  %1257 = vmatpush3.bf16.msra.mxu1 %v1220_v33 }
  0x11   : > { %1120 = vmatprep.mubr.msk.f32.mxu0 %vm257_vm0, %v228_v11  ;;  %1211 = vmatpush3.bf16.msra.mxu0 %v1208_v8  ;;  %v231_v15 = vld [vmem:[%s1478_s15 + $0x18] sm:$0xff]  ;;  %v232_v16 = vld [vmem:[%s1478_s15 + $0x20] sm:$0xff]  ;;  %v233_v17 = vld [vmem:[%s1478_s15 + $0x28] sm:$0xff] }
  0x12   : > { %1213 = vmatprep.subr.bf16.mxu0 %v1212_v12  ;;  %v234_v18 = vld [vmem:[%s1478_s15 + $0x30] sm:$0xff]  ;;  %v235_v19 = vld [vmem:[%s1478_s15 + $0x38] sm:$0xff]  ;;  %v236_v20 = vld [vmem:[%s1478_s15 + $0x40] sm:$0xff]  ;;  %1250 = vmatprep.subr.bf16.mxu1 %v1224_v36 }
  0x13   : > { %v237_v21 = vld [vmem:[%s1478_s15 + $0x48] sm:$0xff]  ;;  %v238_v22 = vld [vmem:[%s1478_s15 + $0x50] sm:$0xff]  ;;  %v239_v23 = vld [vmem:[%s1478_s15 + $0x58] sm:$0xff] }
  0x14   : > { %v240_v24 = vld [vmem:[%s1478_s15 + $0x60] sm:$0xff]  ;;  %v241_v25 = vld [vmem:[%s1478_s15 + $0x68] sm:$0xff]  ;;  %v242_v26 = vld [vmem:[%s1478_s15 + $0x70] sm:$0xff]  ;;  %1258 = vmatpush3.bf16.msra.mxu1 %v1224_v36 }
  0x15   : > { %1215 = vmatpush3.bf16.msra.mxu0 %v1212_v12  ;;  %v243_v27 = vld [vmem:[%s1478_s15 + $0x78] sm:$0xff]  ;;  %1251 = vmatprep.subr.bf16.mxu1 %v1228_v39 }
  0x16   : > { %1217 = vmatprep.subr.bf16.mxu0 %v1216_v30 }
  0x18   : > { %1121 = vmatmul.mubr.msk.f32.vlgmr.msra.gmra.mrb[0].mxu0 %vm257_vm0, %v229_v13  ;;  %1259 = vmatpush3.bf16.msra.mxu1 %v1228_v39 }
  0x19   : > { %1123 = vmatprep.mubr.msk.f32.mxu0 %vm257_vm0, %v230_v14  ;;  %1219 = vmatpush3.bf16.msra.mxu0 %v1216_v30 }
  0x1a   : > { %1221 = vmatprep.subr.bf16.mxu0 %v1220_v33  ;;  %1252 = vmatprep.subr.bf16.mxu1 %v1232_v42 }
  0x1c   : > { %1124 = vmatmul.mubr.msk.f32.gmra.mrb[2].mxu0 %vm257_vm0, %v231_v15  ;;  %1260 = vmatpush3.bf16.msra.mxu1 %v1232_v42 }
  0x1d   : > { %1126 = vmatprep.mubr.msk.f32.mxu0 %vm257_vm0, %v232_v16  ;;  %1223 = vmatpush3.bf16.msra.mxu0 %v1220_v33 }
  0x1e   : > { %1225 = vmatprep.subr.bf16.mxu0 %v1224_v36  ;;  %1253 = vmatprep.subr.bf16.mxu1 %v1236_v45 }
  0x20   : > { %1127 = vmatmul.mubr.msk.f32.gmra.mrb[4].mxu0 %vm257_vm0, %v233_v17  ;;  %1261 = vmatpush3.bf16.msra.mxu1 %v1236_v45 }
  0x21   : > { %1129 = vmatprep.mubr.msk.f32.mxu0 %vm257_vm0, %v234_v18  ;;  %1227 = vmatpush3.bf16.msra.mxu0 %v1224_v36 }
  0x22   : > { %1229 = vmatprep.subr.bf16.mxu0 %v1228_v39  ;;  %1254 = vmatprep.subr.bf16.mxu1 %v1240_v48 }
  0x24   : > { %1130 = vmatmul.mubr.msk.f32.gmra.mrb[6].mxu0 %vm257_vm0, %v235_v19  ;;  %1262 = vmatpush3.bf16.msra.mxu1 %v1240_v48 }
  0x25   : > { %1132 = vmatprep.mubr.msk.f32.mxu0 %vm257_vm0, %v236_v20  ;;  %1231 = vmatpush3.bf16.msra.mxu0 %v1228_v39 }
  0x26   : > { %1233 = vmatprep.subr.bf16.mxu0 %v1232_v42  ;;  %1255 = vmatprep.subr.bf16.mxu1 %v1244_v51 }
  0x28   : > { %1133 = vmatmul.mubr.msk.f32.gmra.mrb[8].mxu0 %vm257_vm0, %v237_v21  ;;  %1263 = vmatpush3.bf16.msra.mxu1 %v1244_v51 }
  0x29   : > { %1135 = vmatprep.mubr.msk.f32.mxu0 %vm257_vm0, %v238_v22  ;;  %1235 = vmatpush3.bf16.msra.mxu0 %v1232_v42 }
  0x2a   : > { %1237 = vmatprep.subr.bf16.mxu0 %v1236_v45 }
  0x2c   : > { %1136 = vmatmul.mubr.msk.f32.gmra.mrb[10].mxu0 %vm257_vm0, %v239_v23 }
  0x2d   : > { %1138 = vmatprep.mubr.msk.f32.mxu0 %vm257_vm0, %v240_v24  ;;  %1239 = vmatpush3.bf16.msra.mxu0 %v1236_v45 }
  0x2e   : > { %1241 = vmatprep.subr.bf16.mxu0 %v1240_v48 }
  0x30   : > { %1139 = vmatmul.mubr.msk.f32.gmra.mrb[12].mxu0 %vm257_vm0, %v241_v25 }
  0x31   : > { %1141 = vmatprep.mubr.msk.f32.mxu0 %vm257_vm0, %v242_v26  ;;  %1243 = vmatpush3.bf16.msra.mxu0 %v1240_v48 }
  0x32   : > { %1245 = vmatprep.subr.bf16.mxu0 %v1244_v51 }
  0x34   : > { %1142 = vmatmul.mubr.msk.f32.gmra.mrb[14].mxu0 %vm257_vm0, %v243_v27 }
  0x35   : > { %1247 = vmatpush3.bf16.msra.mxu0 %v1244_v51 }
  0xeb   : > { %v1122_v57 = vpop.f32.mrb[0].mxu0 }
  0xec   : > { %v1572_v58 = vadd.f32 %v1122_v57, %v1569_v56  ;;  %v372_v59 = vpop.f32.mrb[1].mxu0 }
  0xed   : > { %v1575_v60 = vadd.f32 %v372_v59, %v1569_v56 }
  0xee   : > { %v1014_v61 = vmul.f32 -1.442695, %v1572_v58 }
  0xef   : > { %v1013_v62 = vmul.f32 -1.442695, %v1575_v60  ;;  %v1125_v63 = vpop.f32.mrb[2].mxu0 }
  0xf0   : > { %1272 = vpow2.f32 %v1014_v61  ;;  %v1580_v0 = vadd.f32 %v1125_v63, %v1569_v56  ;;  %v382_v1 = vpop.f32.mrb[3].mxu0 }
  0xf1   : > { %1274 = vpow2.f32 %v1013_v62  ;;  %v1583_v2 = vadd.f32 %v382_v1, %v1569_v56 }
  0xf2   : > { %v1016_v3 = vmul.f32 -1.442695, %v1580_v0 }
  0xf3   : > { %v1015_v4 = vmul.f32 -1.442695, %v1583_v2  ;;  %v1128_v5 = vpop.f32.mrb[4].mxu0 }
  0xf4   : > { %1276 = vpow2.f32 %v1016_v3  ;;  %v1588_v6 = vadd.f32 %v1128_v5, %v1569_v56  ;;  %v392_v7 = vpop.f32.mrb[5].mxu0 }
  0xf5   : > { %1278 = vpow2.f32 %v1015_v4  ;;  %v1591_v8 = vadd.f32 %v392_v7, %v1569_v56 }
  0xf6   : > { %v1018_v9 = vmul.f32 -1.442695, %v1588_v6 }
  0xf7   : > { %v1017_v10 = vmul.f32 -1.442695, %v1591_v8  ;;  %v1131_v11 = vpop.f32.mrb[6].mxu0 }
  0xf8   : > { %1280 = vpow2.f32 %v1018_v9  ;;  %v1596_v12 = vadd.f32 %v1131_v11, %v1569_v56  ;;  %v402_v13 = vpop.f32.mrb[7].mxu0 }
  0xf9   : > { %1282 = vpow2.f32 %v1017_v10  ;;  %v1599_v14 = vadd.f32 %v402_v13, %v1569_v56 }
  0xfa   : > { %v1273_v15 = vpop.eup %1272  ;;  %v1020_v16 = vmul.f32 -1.442695, %v1596_v12 }
  0xfb   : > { %v1275_v17 = vpop.eup %1274  ;;  %v500_v18 = vadd.f32 1.0, %v1273_v15  ;;  %v1019_v19 = vmul.f32 -1.442695, %v1599_v14  ;;  %v1134_v20 = vpop.f32.mrb[8].mxu0 }
  0xfc   : > { %v499_v21 = vadd.f32 1.0, %v1275_v17  ;;  %1284 = vpow2.f32 %v1020_v16  ;;  %v1604_v22 = vadd.f32 %v1134_v20, %v1569_v56  ;;  %v412_v23 = vpop.f32.mrb[9].mxu0 }
  0xfd   : > { %1286 = vrcp.f32 %v500_v18  ;;  %v1607_v24 = vadd.f32 %v412_v23, %v1569_v56 }
  0xfe   : > { %v1277_v25 = vpop.eup %1276  ;;  %1288 = vrcp.f32 %v499_v21  ;;  %v1022_v26 = vmul.f32 -1.442695, %v1604_v22 }
  0xff   : > { %v1279_v27 = vpop.eup %1278  ;;  %v502_v28 = vadd.f32 1.0, %v1277_v25  ;;  %1290 = vpow2.f32 %v1019_v19  ;;  %v1021_v29 = vmul.f32 -1.442695, %v1607_v24  ;;  %v1137_v30 = vpop.f32.mrb[10].mxu0 }
 0x100   : > { %v501_v31 = vadd.f32 1.0, %v1279_v27  ;;  %1292 = vpow2.f32 %v1022_v26  ;;  %v1612_v32 = vadd.f32 %v1137_v30, %v1569_v56  ;;  %v422_v33 = vpop.f32.mrb[11].mxu0 }
 0x101   : > { %1294 = vrcp.f32 %v502_v28  ;;  %v1615_v34 = vadd.f32 %v422_v33, %v1569_v56 }
 0x102   : > { %v1281_v35 = vpop.eup %1280  ;;  %1296 = vrcp.f32 %v501_v31  ;;  %v1024_v36 = vmul.f32 -1.442695, %v1612_v32 }
 0x103   : > { %v1283_v37 = vpop.eup %1282  ;;  %v504_v38 = vadd.f32 1.0, %v1281_v35  ;;  %1298 = vpow2.f32 %v1021_v29  ;;  %v1023_v39 = vmul.f32 -1.442695, %v1615_v34  ;;  %v1140_v40 = vpop.f32.mrb[12].mxu0 }
 0x104   : > { %v503_v41 = vadd.f32 1.0, %v1283_v37  ;;  %1300 = vpow2.f32 %v1024_v36  ;;  %v1620_v42 = vadd.f32 %v1140_v40, %v1569_v56  ;;  %v432_v43 = vpop.f32.mrb[13].mxu0 }
 0x105   : > { %1302 = vrcp.f32 %v504_v38  ;;  %v1623_v44 = vadd.f32 %v432_v43, %v1569_v56 }
 0x106   : > { %v1285_v45 = vpop.eup %1284  ;;  %1304 = vrcp.f32 %v503_v41  ;;  %v1026_v46 = vmul.f32 -1.442695, %v1620_v42 }
 0x107   : > { %v1287_v47 = vpop.eup %1286  ;;  %v506_v48 = vadd.f32 1.0, %v1285_v45  ;;  %1306 = vpow2.f32 %v1023_v39  ;;  %v1025_v49 = vmul.f32 -1.442695, %v1623_v44  ;;  %v1143_v50 = vpop.f32.mrb[14].mxu0 }
 0x108   : > { %v1289_v51 = vpop.eup %1288  ;;  %1308 = vpow2.f32 %v1026_v46  ;;  %v1628_v52 = vadd.f32 %v1143_v50, %v1569_v56  ;;  %v442_v54 = vpop.f32.mrb[15].mxu0  ;;  %v548_v63 = vmul.f32 %v1287_v47, %v1572_v58 }
 0x109   : > { %v1291_v57 = vpop.eup %1290  ;;  %v547_v59 = vmul.f32 %v1289_v51, %v1575_v60  ;;  %v1632_v61 = vadd.f32 %v442_v54, %v1569_v56  ;;  %1310 = vpow2.f32 %v1025_v49 }
 0x10a   : > { %v1293_v62 = vpop.eup %1292  ;;  %v505_v1 = vadd.f32 1.0, %v1291_v57  ;;  %v1028_v3 = vmul.f32 -1.442695, %v1628_v52  ;;  %1312 = vrcp.f32 %v506_v48 }
 0x10b   : > { %v1295_v4 = vpop.eup %1294  ;;  %v508_v5 = vadd.f32 1.0, %v1293_v62  ;;  %v1027_v7 = vmul.f32 -1.442695, %v1632_v61  ;;  %1176 = vmatprep.mubr.f32.mxu0 %v547_v59 }
 0x10c   : > { %v1297_v9 = vpop.eup %1296  ;;  %1314 = vrcp.f32 %v505_v1  ;;  %1177 = vmatmul.mubr.f32.vlgmr.msra.gmra.mrb[16].mxu0 %v548_v63  ;;  %v550_v58 = vmul.f32 %v1295_v4, %v1580_v0 }
 0x10d   : > { %v1299_v60 = vpop.eup %1298  ;;  %v549_v56 = vmul.f32 %v1297_v9, %v1583_v2  ;;  %1316 = vrcp.f32 %v508_v5 }
 0x10e   : > { %v1301_v10 = vpop.eup %1300  ;;  %v507_v11 = vadd.f32 1.0, %v1299_v60  ;;  %1318 = vpow2.f32 %v1028_v3 }
 0x10f   : > { %v1303_v13 = vpop.eup %1302  ;;  %v510_v15 = vadd.f32 1.0, %v1301_v10  ;;  %1320 = vpow2.f32 %v1027_v7  ;;  %1179 = vmatprep.mubr.f32.mxu0 %v549_v56 }
 0x110   : > { %v1305_v16 = vpop.eup %1304  ;;  %1322 = vrcp.f32 %v507_v11  ;;  %1180 = vmatmul.mubr.f32.gmra.mrb[18].mxu0 %v550_v58  ;;  %v552_v20 = vmul.f32 %v1303_v13, %v1588_v6 }
 0x111   : > { %v1307_v17 = vpop.eup %1306  ;;  %v551_v18 = vmul.f32 %v1305_v16, %v1591_v8  ;;  %1324 = vrcp.f32 %v510_v15 }
 0x112   : > { %v1309_v19 = vpop.eup %1308  ;;  %v509_v2 = vadd.f32 1.0, %v1307_v17 }
 0x113   : > { %v512_v21 = vadd.f32 1.0, %v1309_v19  ;;  %1182 = vmatprep.mubr.f32.mxu1 %v551_v18  ;;  %v1311_v0 = vpop.eup %1310 }
 0x114   : > { %1326 = vrcp.f32 %v509_v2  ;;  %1183 = vmatmul.mubr.f32.vlgmr.msra.gmra.mrb[0].mxu1 %v552_v20  ;;  %v1313_v23 = vpop.eup %1312  ;;  %v511_v25 = vadd.f32 1.0, %v1311_v0 }
 0x115   : > { %1328 = vrcp.f32 %v512_v21  ;;  %v554_v8 = vmul.f32 %v1313_v23, %v1596_v12 }
 0x116   : > { %v1315_v26 = vpop.eup %1314  ;;  %1330 = vrcp.f32 %v511_v25 }
 0x117   : > { %v1317_v27 = vpop.eup %1316  ;;  %v553_v28 = vmul.f32 %v1315_v26, %v1599_v14 }
 0x118   : > { %v1319_v29 = vpop.eup %1318  ;;  %v556_v36 = vmul.f32 %v1317_v27, %v1604_v22 }
 0x119   : > { %v1321_v30 = vpop.eup %1320  ;;  %v514_v6 = vadd.f32 1.0, %v1319_v29  ;;  %1185 = vmatprep.mubr.f32.mxu1 %v553_v28 }
 0x11a   : > { %v1323_v31 = vpop.eup %1322  ;;  %v513_v33 = vadd.f32 1.0, %v1321_v30  ;;  %1186 = vmatmul.mubr.f32.gmra.mrb[2].mxu1 %v554_v8 }
 0x11b   : > { %v555_v35 = vmul.f32 %v1323_v31, %v1607_v24  ;;  %1332 = vrcp.f32 %v514_v6  ;;  %v1325_v37 = vpop.eup %1324 }
 0x11c   : > { %1334 = vrcp.f32 %v513_v33  ;;  %v558_v12 = vmul.f32 %v1325_v37, %v1612_v32 }
 0x11d   : > { %1188 = vmatprep.mubr.f32.mxu1 %v555_v35 }
 0x11e   : > { %v1327_v38 = vpop.eup %1326  ;;  %1189 = vmatmul.mubr.f32.gmra.mrb[4].mxu1 %v556_v36 }
 0x11f   : > { %v557_v14 = vmul.f32 %v1327_v38, %v1615_v34  ;;  %v1329_v39 = vpop.eup %1328  ;;  %v581_v34 = vsub.s32 1, %v1560_v53 }
 0x120   : > { %v1331_v40 = vpop.eup %1330  ;;  %v560_v24 = vmul.f32 %v1329_v39, %v1620_v42 }
 0x121   : > { %1191 = vmatprep.mubr.f32.mxu1 %v557_v14  ;;  %v559_v41 = vmul.f32 %v1331_v40, %v1623_v44  ;;  %v1653_v32 = vrot.slane %v1566_v55, %v581_v34  ;;  %v1712_v40 = vld [vmem:[%s1804_s4] ss:$0 sm:$0xff] }
 0x122   : > { %1192 = vmatmul.mubr.f32.gmra.mrb[6].mxu1 %v558_v12 }
 0x123   : > { %1194 = vmatprep.mubr.f32.mxu1 %v559_v41 }
 0x125   : > { %v1333_v43 = vpop.eup %1332 }
 0x126   : > { %v1335_v22 = vpop.eup %1334  ;;  %1195 = vmatmul.mubr.f32.gmra.mrb[8].mxu1 %v560_v24  ;;  %v562_v46 = vmul.f32 %v1333_v43, %v1628_v52 }
 0x127   : > { %v561_v45 = vmul.f32 %v1335_v22, %v1632_v61 }
 0x129   : > { %1197 = vmatprep.mubr.f32.mxu1 %v561_v45 }
 0x12a   : > { %1198 = vmatmul.mubr.f32.gmra.mrb[10].mxu1 %v562_v46 }
 0x1df   : > { %v1178_v47 = vpop.f32.mrb[16].mxu0 }
 0x1e0   : > { %v1656_v44 = vadd.f32 %v1178_v47, %v1653_v32  ;;  %v649_v42 = vpop.f32.mrb[17].mxu0 }
 0x1e1   : > { %v1659_v48 = vadd.f32 %v649_v42, %v1653_v32 }
 0x1e2   : > { %v1030_v49 = vmul.f32 -1.442695, %v1656_v44 }
 0x1e3   : > { %v1029_v50 = vmul.f32 -1.442695, %v1659_v48  ;;  %v1181_v51 = vpop.f32.mrb[18].mxu0 }
 0x1e4   : > { %1336 = vpow2.f32 %v1030_v49  ;;  %v1664_v52 = vadd.f32 %v1181_v51, %v1653_v32  ;;  %v659_v54 = vpop.f32.mrb[19].mxu0 }
 0x1e5   : > { %1338 = vpow2.f32 %v1029_v50  ;;  %v1667_v57 = vadd.f32 %v659_v54, %v1653_v32 }
 0x1e6   : > { %v1032_v59 = vmul.f32 -1.442695, %v1664_v52 }
 0x1e7   : > { %v1031_v61 = vmul.f32 -1.442695, %v1667_v57  ;;  %v1184_v62 = vpop.f32.mrb[0].mxu1 }
 0x1e8   : > { %1340 = vpow2.f32 %v1032_v59  ;;  %v1672_v63 = vadd.f32 %v1184_v62, %v1653_v32  ;;  %v669_v1 = vpop.f32.mrb[1].mxu1 }
 0x1e9   : > { %1342 = vpow2.f32 %v1031_v61  ;;  %v1675_v3 = vadd.f32 %v669_v1, %v1653_v32 }
 0x1ea   : > { %v1034_v4 = vmul.f32 -1.442695, %v1672_v63 }
 0x1eb   : > { %v1033_v5 = vmul.f32 -1.442695, %v1675_v3 }
 0x1ec   : > { %1344 = vpow2.f32 %v1034_v4 }
 0x1ed   : > { %1346 = vpow2.f32 %v1033_v5  ;;  %v1187_v7 = vpop.f32.mrb[2].mxu1 }
 0x1ee   : > { %v1337_v9 = vpop.eup %1336  ;;  %v1680_v60 = vadd.f32 %v1187_v7, %v1653_v32  ;;  %v679_v56 = vpop.f32.mrb[3].mxu1 }
 0x1ef   : > { %v1339_v10 = vpop.eup %1338  ;;  %v777_v58 = vadd.f32 1.0, %v1337_v9  ;;  %v1683_v11 = vadd.f32 %v679_v56, %v1653_v32 }
 0x1f0   : > { %v776_v13 = vadd.f32 1.0, %v1339_v10  ;;  %v1036_v15 = vmul.f32 -1.442695, %v1680_v60 }
 0x1f1   : > { %1348 = vrcp.f32 %v777_v58  ;;  %v1035_v16 = vmul.f32 -1.442695, %v1683_v11  ;;  %v1190_v17 = vpop.f32.mrb[4].mxu1 }
 0x1f2   : > { %v1341_v18 = vpop.eup %1340  ;;  %1350 = vrcp.f32 %v776_v13  ;;  %v1688_v19 = vadd.f32 %v1190_v17, %v1653_v32  ;;  %v689_v20 = vpop.f32.mrb[5].mxu1 }
 0x1f3   : > { %v1343_v2 = vpop.eup %1342  ;;  %v779_v21 = vadd.f32 1.0, %v1341_v18  ;;  %1352 = vpow2.f32 %v1036_v15  ;;  %v1691_v0 = vadd.f32 %v689_v20, %v1653_v32 }
 0x1f4   : > { %v778_v23 = vadd.f32 1.0, %v1343_v2  ;;  %1354 = vpow2.f32 %v1035_v16  ;;  %v1038_v25 = vmul.f32 -1.442695, %v1688_v19 }
 0x1f5   : > { %1356 = vrcp.f32 %v779_v21  ;;  %v1037_v26 = vmul.f32 -1.442695, %v1691_v0  ;;  %v1193_v27 = vpop.f32.mrb[6].mxu1 }
 0x1f6   : > { %v1345_v28 = vpop.eup %1344  ;;  %1358 = vrcp.f32 %v778_v23  ;;  %v1696_v29 = vadd.f32 %v1193_v27, %v1653_v32  ;;  %v699_v8 = vpop.f32.mrb[7].mxu1 }
 0x1f7   : > { %v1347_v30 = vpop.eup %1346  ;;  %v781_v6 = vadd.f32 1.0, %v1345_v28  ;;  %1360 = vpow2.f32 %v1038_v25  ;;  %v1699_v31 = vadd.f32 %v699_v8, %v1653_v32 }
 0x1f8   : > { %v780_v33 = vadd.f32 1.0, %v1347_v30  ;;  %1362 = vpow2.f32 %v1037_v26  ;;  %v1040_v35 = vmul.f32 -1.442695, %v1696_v29 }
 0x1f9   : > { %1364 = vrcp.f32 %v781_v6  ;;  %v1039_v36 = vmul.f32 -1.442695, %v1699_v31  ;;  %v1196_v37 = vpop.f32.mrb[8].mxu1 }
 0x1fa   : > { %1366 = vrcp.f32 %v780_v33  ;;  %v1704_v38 = vadd.f32 %v1196_v37, %v1653_v32  ;;  %v709_v14 = vpop.f32.mrb[9].mxu1 }
 0x1fb   : > { %v1349_v39 = vpop.eup %1348  ;;  %1368 = vpow2.f32 %v1040_v35  ;;  %v1707_v12 = vadd.f32 %v709_v14, %v1653_v32 }
 0x1fc   : > { %v1351_v41 = vpop.eup %1350  ;;  %1370 = vpow2.f32 %v1039_v36  ;;  %v1042_v24 = vmul.f32 -1.442695, %v1704_v38  ;;  %v825_v43 = vmul.f32 %v1349_v39, %v1656_v44 }
 0x1fd   : > { %v1353_v22 = vpop.eup %1352  ;;  %v824_v45 = vmul.f32 %v1351_v41, %v1659_v48  ;;  %v1041_v46 = vmul.f32 -1.442695, %v1707_v12  ;;  %v1199_v34 = vpop.f32.mrb[10].mxu1 }
 0x1fe   : > { %v1355_v47 = vpop.eup %1354  ;;  %v783_v42 = vadd.f32 1.0, %v1353_v22  ;;  %1372 = vpow2.f32 %v1042_v24  ;;  %v1719_v49 = vadd.f32 %v1199_v34, %v1653_v32  ;;  %v719_v50 = vpop.f32.mrb[11].mxu1  ;;  %v848_v51 = vmul.f32 %v1712_v40, %v825_v43 }
 0x1ff   : > { %v1357_v54 = vpop.eup %1356  ;;  %v782_v59 = vadd.f32 1.0, %v1355_v47  ;;  %1374 = vpow2.f32 %v1041_v46  ;;  %v1723_v44 = vadd.f32 %v719_v50, %v1653_v32  ;;  %v847_v5 = vmul.f32 %v1712_v40, %v824_v45 }
 0x200   : > { %v1359_v61 = vpop.eup %1358  ;;  %1376 = vrcp.f32 %v783_v42  ;;  %v1044_v48 = vmul.f32 -1.442695, %v1719_v49  ;;  %865 = vadd.xlane.f32.xlu0 %v848_v51  ;;  %v827_v62 = vmul.f32 %v1357_v54, %v1664_v52 }
 0x201   : > { %v1361_v1 = vpop.eup %1360  ;;  %1378 = vrcp.f32 %v782_v59  ;;  %v1043_v4 = vmul.f32 -1.442695, %v1723_v44  ;;  %v826_v9 = vmul.f32 %v1359_v61, %v1667_v57 }
 0x202   : > { %v1363_v7 = vpop.eup %1362  ;;  %v785_v56 = vadd.f32 1.0, %v1361_v1  ;;  %1380 = vpow2.f32 %v1044_v48  ;;  %v850_v32 = vmul.f32 %v1712_v40, %v827_v62 }
 0x203   : > { %v1365_v10 = vpop.eup %1364  ;;  %v784_v58 = vadd.f32 1.0, %v1363_v7  ;;  %1382 = vpow2.f32 %v1043_v4  ;;  %v849_v57 = vmul.f32 %v1712_v40, %v826_v9 }
 0x204   : > { %v1367_v13 = vpop.eup %1366  ;;  %1384 = vrcp.f32 %v785_v56  ;;  %869 = vadd.xlane.f32.xlu1 %v850_v32  ;;  %863 = vadd.xlane.f32.xlu0 %v847_v5  ;;  %v829_v17 = vmul.f32 %v1365_v10, %v1672_v63 }
 0x205   : > { %v1369_v52 = vpop.eup %1368  ;;  %v828_v15 = vmul.f32 %v1367_v13, %v1675_v3  ;;  %1386 = vrcp.f32 %v784_v58 }
 0x206   : > { %v1371_v16 = vpop.eup %1370  ;;  %v787_v18 = vadd.f32 1.0, %v1369_v52  ;;  %v852_v3 = vmul.f32 %v1712_v40, %v829_v17 }
 0x207   : > { %v786_v20 = vadd.f32 1.0, %v1371_v16  ;;  %v851_v2 = vmul.f32 %v1712_v40, %v828_v15 }
 0x208   : > { %v1373_v21 = vpop.eup %1372  ;;  %1388 = vrcp.f32 %v787_v18  ;;  %867 = vadd.xlane.f32.xlu1 %v849_v57 }
 0x209   : > { %v1375_v23 = vpop.eup %1374  ;;  %1390 = vrcp.f32 %v786_v20  ;;  %v789_v25 = vadd.f32 1.0, %v1373_v21  ;;  %871 = vadd.xlane.f32.xlu0 %v851_v2 }
 0x20a   : > { %v1377_v26 = vpop.eup %1376  ;;  %v788_v27 = vadd.f32 1.0, %v1375_v23 }
 0x20b   : > { %v1379_v28 = vpop.eup %1378  ;;  %v831_v63 = vmul.f32 %v1377_v26, %v1680_v60  ;;  %1392 = vrcp.f32 %v789_v25 }
 0x20c   : > { %v1381_v8 = vpop.eup %1380  ;;  %v830_v30 = vmul.f32 %v1379_v28, %v1683_v11  ;;  %1394 = vrcp.f32 %v788_v27  ;;  %873 = vadd.xlane.f32.xlu1 %v852_v3 }
 0x20d   : > { %v1383_v6 = vpop.eup %1382  ;;  %v791_v33 = vadd.f32 1.0, %v1381_v8  ;;  %v854_v14 = vmul.f32 %v1712_v40, %v831_v63 }
 0x20e   : > { %v1385_v35 = vpop.eup %1384  ;;  %v790_v36 = vadd.f32 1.0, %v1383_v6  ;;  %v853_v37 = vmul.f32 %v1712_v40, %v830_v30 }
 0x20f   : > { %v1387_v39 = vpop.eup %1386  ;;  %v833_v41 = vmul.f32 %v1385_v35, %v1688_v19  ;;  %1396 = vrcp.f32 %v791_v33 }
 0x210   : > { %v832_v60 = vmul.f32 %v1387_v39, %v1691_v0  ;;  %1398 = vrcp.f32 %v790_v36  ;;  %875 = vadd.xlane.f32.xlu0 %v853_v37  ;;  %877 = vadd.xlane.f32.xlu1 %v854_v14 }
 0x211   : > { %v856_v43 = vmul.f32 %v1712_v40, %v833_v41 }
 0x212   : > { %v1389_v11 = vpop.eup %1388  ;;  %v855_v24 = vmul.f32 %v1712_v40, %v832_v60 }
 0x213   : > { %v1391_v22 = vpop.eup %1390  ;;  %v835_v45 = vmul.f32 %v1389_v11, %v1696_v29 }
 0x214   : > { %v834_v46 = vmul.f32 %v1391_v22, %v1699_v31  ;;  %879 = vadd.xlane.f32.xlu0 %v855_v24  ;;  %881 = vadd.xlane.f32.xlu1 %v856_v43 }
 0x215   : > { %v1393_v34 = vpop.eup %1392  ;;  %v858_v42 = vmul.f32 %v1712_v40, %v835_v45 }
 0x216   : > { %v1395_v19 = vpop.eup %1394  ;;  %v837_v47 = vmul.f32 %v1393_v34, %v1704_v38  ;;  %v857_v0 = vmul.f32 %v1712_v40, %v834_v46 }
 0x217   : > { %v836_v50 = vmul.f32 %v1395_v19, %v1707_v12  ;;  %v897_v12 = vsub.s32 2, %v1560_v53 }
 0x218   : > { %883 = vadd.xlane.f32.xlu0 %v857_v0  ;;  %885 = vadd.xlane.f32.xlu1 %v858_v42  ;;  %v860_v59 = vmul.f32 %v1712_v40, %v837_v47 }
 0x219   : > { %v1397_v51 = vpop.eup %1396  ;;  %v859_v29 = vmul.f32 %v1712_v40, %v836_v50  ;;  %v898_v62 = vrot.slane %v1566_v55, %v897_v12 }
 0x21a   : > { %v1399_v54 = vpop.eup %1398  ;;  %v839_v31 = vmul.f32 %v1397_v51, %v1719_v49 }
 0x21b   : > { %v838_v61 = vmul.f32 %v1399_v54, %v1723_v44 }
 0x21c   : > { %887 = vadd.xlane.f32.xlu0 %v859_v29  ;;  %889 = vadd.xlane.f32.xlu1 %v860_v59  ;;  %v862_v48 = vmul.f32 %v1712_v40, %v839_v31 }
 0x21d   : > { %v861_v38 = vmul.f32 %v1712_v40, %v838_v61 }
 0x220   : > { %891 = vadd.xlane.f32.xlu0 %v861_v38  ;;  %893 = vadd.xlane.f32.xlu1 %v862_v48 }
 0x28d   : > { %v866_v49 = vpop.xlane.xlu0 %865 }
 0x28e   : > { %v900_v40 = vadd.f32 %v898_v62, %v866_v49 }
 0x290   : > { %917 = vst.msk [vmem:[%s1763_s10 + $0x8] sm:$0xff] %vm915_vm1, %v900_v40 }
 0x291   : > { %v870_v53 = vpop.xlane.xlu1 %869  ;;  %v864_v44 = vpop.xlane.xlu0 %863 }
 0x292   : > { %v902_v55 = vadd.f32 %v898_v62, %v870_v53  ;;  %v899_v1 = vadd.f32 %v898_v62, %v864_v44 }
 0x294   : > { %919 = vst.msk [vmem:[%s1763_s10 + $0x18] sm:$0xff] %vm915_vm1, %v902_v55  ;;  %916 = vst.msk [vmem:[%s1763_s10] sm:$0xff] %vm915_vm1, %v899_v1 }
 0x295   : > { %v868_v4 = vpop.xlane.xlu1 %867 }
 0x296   : > { %v901_v5 = vadd.f32 %v898_v62, %v868_v4  ;;  %v872_v7 = vpop.xlane.xlu0 %871 }
 0x297   : > { %v903_v9 = vadd.f32 %v898_v62, %v872_v7 }
 0x298   : > { %918 = vst.msk [vmem:[%s1763_s10 + $0x10] sm:$0xff] %vm915_vm1, %v901_v5 }
 0x299   : > { %920 = vst.msk [vmem:[%s1763_s10 + $0x20] sm:$0xff] %vm915_vm1, %v903_v9  ;;  %v874_v56 = vpop.xlane.xlu1 %873 }
 0x29a   : > { %v904_v32 = vadd.f32 %v898_v62, %v874_v56 }
 0x29c   : > { %921 = vst.msk [vmem:[%s1763_s10 + $0x28] sm:$0xff] %vm915_vm1, %v904_v32 }
 0x29d   : > { %v876_v10 = vpop.xlane.xlu0 %875  ;;  %v878_v58 = vpop.xlane.xlu1 %877 }
 0x29e   : > { %v905_v13 = vadd.f32 %v898_v62, %v876_v10  ;;  %v906_v52 = vadd.f32 %v898_v62, %v878_v58 }
 0x2a0   : > { %922 = vst.msk [vmem:[%s1763_s10 + $0x30] sm:$0xff] %vm915_vm1, %v905_v13  ;;  %923 = vst.msk [vmem:[%s1763_s10 + $0x38] sm:$0xff] %vm915_vm1, %v906_v52 }
 0x2a1   : > { %v880_v15 = vpop.xlane.xlu0 %879  ;;  %v882_v16 = vpop.xlane.xlu1 %881 }
 0x2a2   : > { %v907_v17 = vadd.f32 %v898_v62, %v880_v15  ;;  %v908_v18 = vadd.f32 %v898_v62, %v882_v16 }
 0x2a4   : > { %924 = vst.msk [vmem:[%s1763_s10 + $0x40] sm:$0xff] %vm915_vm1, %v907_v17  ;;  %925 = vst.msk [vmem:[%s1763_s10 + $0x48] sm:$0xff] %vm915_vm1, %v908_v18 }
 0x2a5   : > { %v884_v57 = vpop.xlane.xlu0 %883  ;;  %v886_v20 = vpop.xlane.xlu1 %885 }
 0x2a6   : > { %v909_v2 = vadd.f32 %v898_v62, %v884_v57  ;;  %v910_v21 = vadd.f32 %v898_v62, %v886_v20 }
 0x2a8   : > { %926 = vst.msk [vmem:[%s1763_s10 + $0x50] sm:$0xff] %vm915_vm1, %v909_v2  ;;  %927 = vst.msk [vmem:[%s1763_s10 + $0x58] sm:$0xff] %vm915_vm1, %v910_v21 }
 0x2a9   : > { %v888_v23 = vpop.xlane.xlu0 %887  ;;  %v890_v25 = vpop.xlane.xlu1 %889 }
 0x2aa   : > { %v911_v26 = vadd.f32 %v898_v62, %v888_v23  ;;  %v912_v27 = vadd.f32 %v898_v62, %v890_v25 }
 0x2ac   : > { %928 = vst.msk [vmem:[%s1763_s10 + $0x60] sm:$0xff] %vm915_vm1, %v911_v26  ;;  %929 = vst.msk [vmem:[%s1763_s10 + $0x68] sm:$0xff] %vm915_vm1, %v912_v27 }
 0x2ad   : > { %v892_v3 = vpop.xlane.xlu0 %891  ;;  %v894_v28 = vpop.xlane.xlu1 %893 }
 0x2ae   : > { %v913_v63 = vadd.f32 %v898_v62, %v892_v3  ;;  %v914_v8 = vadd.f32 %v898_v62, %v894_v28 }
 0x2b0   : > { %930 = vst.msk [vmem:[%s1763_s10 + $0x70] sm:$0xff] %vm915_vm1, %v913_v63  ;;  %931 = vst.msk [vmem:[%s1763_s10 + $0x78] sm:$0xff] %vm915_vm1, %v914_v8 }
 0x2b1 PF: > { %s15_s18 = sadd.s32 1, %s1406_s18  }
 0x2b2   : > { %p12_p4 = scmp.ge.s32.totalorder %s15_s18, 4  }
 0x2b4   :  { %14 = sbr.rel (!%p12_p4) target bundleno = 1 (0x1), region = 70 }

</bundles_post_ra>
